<compile_context>
chip_gen: v7x
topology: tpu7x:2x2x1
jax: 0.10.0
libtpu: 0.0.40
codegen_flags: <defaults>
</compile_context>

<pallas_src>
import jax
import jax.numpy as jnp
from jax.experimental import pallas as pl
from jax.experimental.pallas import tpu as pltpu


_TARGET_CHUNK_BYTES = 8 * 1024 * 1024   # aim for ~8 MiB per DMA chunk
_MIN_SPLIT_BYTES = 1 * 1024 * 1024      # split into >= 2 chunks above this (v7x 2-TC)
_MAX_CHUNKS = 16                        # cap per-grid-step overhead


def _whole_copy_kernel(x_hbm, o_hbm, sem):
    # Single HBM -> HBM DMA of the entire array.
    cp = pltpu.make_async_copy(x_hbm, o_hbm, sem)
    cp.start()
    cp.wait()


def _make_chunked_kernel(chunk_rows, num_full, rem_rows):
    """Grid step i DMAs rows [i*chunk_rows, i*chunk_rows + chunk) of axis 0."""

    def kernel(x_hbm, o_hbm, sem):
        i = pl.program_id(0)

        if rem_rows == 0:
            base = pl.multiple_of(i * chunk_rows, chunk_rows)
            cp = pltpu.make_async_copy(
                x_hbm.at[pl.ds(base, chunk_rows)],
                o_hbm.at[pl.ds(base, chunk_rows)],
                sem,
            )
            cp.start()
            cp.wait()
        else:
            @pl.when(i < num_full)
            def _():
                base = pl.multiple_of(i * chunk_rows, chunk_rows)
                cp = pltpu.make_async_copy(
                    x_hbm.at[pl.ds(base, chunk_rows)],
                    o_hbm.at[pl.ds(base, chunk_rows)],
                    sem,
                )
                cp.start()
                cp.wait()

            @pl.when(i == num_full)
            def _():
                base = num_full * chunk_rows  # static remainder offset
                cp = pltpu.make_async_copy(
                    x_hbm.at[pl.ds(base, rem_rows)],
                    o_hbm.at[pl.ds(base, rem_rows)],
                    sem,
                )
                cp.start()
                cp.wait()

    return kernel


def empty_layer_forward(x,
                        target_chunk_bytes=_TARGET_CHUNK_BYTES,
                        min_split_bytes=_MIN_SPLIT_BYTES):
    """Identity forward of emptyLayer via a chunked HBM->HBM DMA kernel."""
    if x.size == 0:
        return x  # nothing to copy
    if x.ndim == 0:
        return empty_layer_forward(
            x.reshape(1), target_chunk_bytes, min_split_bytes).reshape(())

    itemsize = jnp.dtype(x.dtype).itemsize
    total_bytes = x.size * itemsize
    cost = pl.CostEstimate(
        flops=0, transcendentals=0, bytes_accessed=2 * total_bytes)
    any_spec = pl.BlockSpec(memory_space=pl.ANY)
    out_shape = jax.ShapeDtypeStruct(x.shape, x.dtype)

    rows = x.shape[0]
    if x.ndim >= 3:
        # Axis 0 is a major dim: any row offset is layout-tile aligned.
        row_align = 1
    elif x.ndim == 2:
        # Axis 0 is the sublane dim: keep chunk offsets on the dtype-native
        # sublane tile (8 f32 / 16 bf16 / 32 int8).
        row_align = max(8, (8 * 4) // itemsize)
    else:
        # 1-D: the only axis is the lane dim; copy in a single DMA.
        row_align = rows

    want_chunks = 1
    if total_bytes >= min_split_bytes:
        want_chunks = max(2, min(_MAX_CHUNKS, total_bytes // target_chunk_bytes))
    num_chunks = min(want_chunks, max(1, rows // row_align))

    if num_chunks <= 1:
        return pl.pallas_call(
            _whole_copy_kernel,
            out_shape=out_shape,
            in_specs=[any_spec],
            out_specs=any_spec,
            scratch_shapes=[pltpu.SemaphoreType.DMA],
            cost_estimate=cost,
        )(x)

    chunk_rows = -(-rows // num_chunks)                   # ceil divide
    chunk_rows = -(-chunk_rows // row_align) * row_align  # round up to alignment
    num_full = rows // chunk_rows
    rem_rows = rows - num_full * chunk_rows
    grid = (num_full + (1 if rem_rows else 0),)

    return pl.pallas_call(
        _make_chunked_kernel(chunk_rows, num_full, rem_rows),
        out_shape=out_shape,
        grid=grid,
        in_specs=[any_spec],
        out_specs=any_spec,
        scratch_shapes=[pltpu.SemaphoreType.DMA],
        cost_estimate=cost,
        compiler_params=pltpu.CompilerParams(
            dimension_semantics=("parallel",)),
    )(x)


if __name__ == "__main__":
    key = jax.random.PRNGKey(0)
    k1, k2, k3 = jax.random.split(key, 3)

    # Main check: small NCHW feature map -> single whole-array HBM->HBM DMA.
    x = jax.random.normal(k1, (2, 4, 16, 16), dtype=jnp.float32)
    y = jax.block_until_ready(empty_layer_forward(x))
    assert y.shape == x.shape and y.dtype == x.dtype
    assert bool(jnp.array_equal(y, x))

    # Exercise the chunked DMA path (with a remainder chunk) at small size by
    # shrinking the chunk-size thresholds.
    x2 = jax.random.normal(k2, (3, 4, 16, 16), dtype=jnp.float32)
    y2 = jax.block_until_ready(
        empty_layer_forward(x2, target_chunk_bytes=6144, min_split_bytes=1024))
    assert y2.shape == x2.shape and y2.dtype == x2.dtype
    assert bool(jnp.array_equal(y2, x2))

    # Exercise 2-D sublane-aligned chunking with a packed dtype (bf16).
    x3 = jax.random.normal(k3, (64, 128), dtype=jnp.float32).astype(jnp.bfloat16)
    y3 = jax.block_until_ready(
        empty_layer_forward(x3, target_chunk_bytes=2048, min_split_bytes=1024))
    assert y3.shape == x3.shape and y3.dtype == x3.dtype
    assert bool(jnp.array_equal(y3, x3))

    print("KERNEL_OK")
</pallas_src>

<mosaic_0001>
module attributes {stable_mosaic.version = 11 : i64} {
  func.func @_whole_copy_kernel(%arg0: memref<2x4x16x16xf32, #tpu.memory_space<any>>, %arg1: memref<2x4x16x16xf32, #tpu.memory_space<any>>, %arg2: memref<!tpu.dma_semaphore, #tpu.memory_space<semaphore_mem>>) attributes {dimension_semantics = [], scalar_prefetch = 0 : i64, scratch_operands = 1 : i64, tpu.core_type = #tpu.core_type<tc>} {
    tpu.enqueue_dma source(%arg0 : memref<2x4x16x16xf32, #tpu.memory_space<any>>) target(%arg1 : memref<2x4x16x16xf32, #tpu.memory_space<any>>) target_semaphore(%arg2 : memref<!tpu.dma_semaphore, #tpu.memory_space<semaphore_mem>>)
    tpu.wait_dma2 semaphore(%arg2 : memref<!tpu.dma_semaphore, #tpu.memory_space<semaphore_mem>>) src(%arg0 : memref<2x4x16x16xf32, #tpu.memory_space<any>>) dst(%arg1 : memref<2x4x16x16xf32, #tpu.memory_space<any>>)
    return
  }
}

</mosaic_0001>

<bundles_post_ra>
// kernel: tpu_custom_call.1
= control target key start
LH: loop header
LB: loop body
LE: loop exit
PB: predicated region body
PF: predicated region fallthrough
CT: control target
= control target key end

     0   :  { %s36_s6 = smov [#allocation2]   ;;  %s37_s7 = smov [#allocation3]   ;;  %s55_s0 = inlined_call_operand.hbm [shape: f32[2,4,16,16], index: 0, kind: input, shape index: {}]   ;;  %s56_s1 = inlined_call_operand.hbm [shape: f32[2,4,16,16], index: 1, kind: output, shape index: {}]  }
   0x1   :  { %s38_s8 = smov 0  }
   0x2   :  { %18 = dma.general %s55_s0, 2048, %s56_s1, %s36_s6, %s37_s7, [#allocation4], %s38_s8, 0  }
   0x3   :  { %34 = dma.done.wait [#allocation2], 2048 }
   0x4   :  { %35 = vsyncadd [#allocation2], 4294965248 }
   0x5   :  { %24 = vsyncmov [#allocation2] }
   0x8   :  { %s25_s13 = vpop.sfrf %24 }
   0x9   :  { %p30_p0 = scmp.ne.s32.totalorder %s25_s13, 0 }
   0xb   :  { %29 = shalt.err (%p30_p0)  }

</bundles_post_ra>
